<compile_context>
chip_gen: v6e
topology: v6e:2x2x1
jax: 0.10.0
libtpu: 0.0.40
codegen_flags: <defaults>
</compile_context>

<pallas_src>
import jax
import jax.numpy as jnp
import numpy as np
from jax.experimental import pallas as pl
from jax.experimental.pallas import tpu as pltpu

# Module hyper-parameters (from __init__)
C_IN, C_OUT, K, STRIDE, PADDING = 1, 4, 5, 1, 5

MAX_N_TILE = 2048            # max lanes per grid step (multiple of 128); sweepable
SMALL_N_PALLAS_CUTOFF = 256  # below this, the fused jnp path beats kernel overhead


def _sigmoid_one_eup(x):
    # sigmoid(x) == 0.5 * tanh(0.5 * x) + 0.5  -> one EUP push per vreg
    return 0.5 * jnp.tanh(0.5 * x) + 0.5


def convtr_sigmoid_kernel(x_ref, w_ref, b_ref, o_ref):
    # x_ref: (C_IN, L_in, N_TILE)   f32, VMEM  (batch on lanes)
    # w_ref: (C_IN*C_OUT*K,)        f32, SMEM, index = (ci*C_OUT + co)*K + k
    # b_ref: (C_OUT,)               f32, SMEM
    # o_ref: (C_OUT, L_out, N_TILE) f32, VMEM
    #
    # Transposed conv (stride=1) as a correlation:
    #   y[co, j, n] = b[co] + sum_{ci,k} x[ci, j + PADDING - k, n] * w[ci, co, k]
    # For this config (K=5, padding=5, L_in=28, L_out=22) every index
    # j + PADDING - k lies strictly inside [0, L_in), so no boundary masking.
    _, l_out, n_tile = o_ref.shape

    # One accumulator per output channel, initialized from the bias.
    accs = [jnp.full((l_out, n_tile), b_ref[co], jnp.float32) for co in range(C_OUT)]

    # k-outer / co-inner: each shifted window is loaded exactly once and feeds
    # all C_OUT accumulators (5 window loads total instead of 20).
    for ci in range(C_IN):
        for k in range(K):
            start = PADDING - k                               # static per unrolled iter
            window = x_ref[ci, start:start + l_out, :]        # (L_out, N_TILE) sublane slice
            for co in range(C_OUT):
                accs[co] = accs[co] + w_ref[(ci * C_OUT + co) * K + k] * window

    for co in range(C_OUT):
        o_ref[co, :, :] = _sigmoid_one_eup(accs[co])


def _choose_n_tile(n, max_tile=MAX_N_TILE):
    """Pick a lane tile (multiple of 128) <= max_tile, keeping grid >= 2 when possible."""
    n128 = ((n + 127) // 128) * 128
    if n128 <= 128:
        return 128
    half = (((n128 // 2) + 127) // 128) * 128   # ~half the lane groups -> >= 2 grid steps
    return max(128, min(max_tile, half))


def _jnp_conv_transpose1d_sigmoid(x, weight, bias):
    """Fused pure-JAX path (scatter definition of ConvTranspose1d). Used for tiny N
    and as the numerical reference."""
    N, c_in, L_in = x.shape
    _, c_out, kk = weight.shape
    L_full = (L_in - 1) * STRIDE + kk
    y = jnp.zeros((N, c_out, L_full), jnp.float32)
    for k in range(kk):
        contrib = jnp.einsum("ncl,co->nol", x.astype(jnp.float32),
                             weight[:, :, k].astype(jnp.float32))
        y = y.at[:, :, k:k + L_in].add(contrib)
    y = y[:, :, PADDING:L_full - PADDING] + bias.astype(jnp.float32)[None, :, None]
    return jax.nn.sigmoid(y)


def conv_transpose1d_sigmoid(x, weight, bias, *,
                             min_pallas_batch=SMALL_N_PALLAS_CUTOFF,
                             max_n_tile=MAX_N_TILE):
    """x: (N, C_in, L_in) f32; weight: (C_in, C_out, K) f32 (PyTorch layout); bias: (C_out,)."""
    N, c_in, L_in = x.shape
    c_in_w, c_out, kk = weight.shape
    assert (c_in, kk) == (C_IN, K) and c_in_w == C_IN and c_out == C_OUT
    L_out = (L_in - 1) * STRIDE - 2 * PADDING + K

    # The no-masking correlation form needs every read index in-bounds.
    in_bounds = (PADDING - (K - 1) >= 0) and ((L_out - 1) + PADDING <= L_in - 1)

    # Tiny batches (or configs needing boundary masking): fused XLA path wins.
    if N < min_pallas_batch or not in_bounds:
        return _jnp_conv_transpose1d_sigmoid(x, weight, bias)

    n_tile = _choose_n_tile(N, max_n_tile)
    n_pad = ((N + n_tile - 1) // n_tile) * n_tile

    # --- layout plumbing: batch on lanes, pad N up to a multiple of n_tile ---
    xt = jnp.transpose(x.astype(jnp.float32), (1, 2, 0))          # (C_IN, L_in, N)
    if n_pad != N:
        xt = jnp.pad(xt, ((0, 0), (0, 0), (0, n_pad - N)))

    # Flatten weight for SMEM scalar reads: w_flat[(ci*C_OUT+co)*K + k] = weight[ci, co, k]
    w_flat = weight.astype(jnp.float32).reshape(-1)
    b_flat = bias.astype(jnp.float32)

    out_t = pl.pallas_call(
        convtr_sigmoid_kernel,
        out_shape=jax.ShapeDtypeStruct((C_OUT, L_out, n_pad), jnp.float32),
        grid=(n_pad // n_tile,),
        in_specs=[
            pl.BlockSpec((C_IN, L_in, n_tile), lambda n: (0, 0, n)),
            pl.BlockSpec(memory_space=pltpu.MemorySpace.SMEM),
            pl.BlockSpec(memory_space=pltpu.MemorySpace.SMEM),
        ],
        out_specs=pl.BlockSpec((C_OUT, L_out, n_tile), lambda n: (0, 0, n)),
        compiler_params=pltpu.CompilerParams(dimension_semantics=("parallel",)),
    )(xt, w_flat, b_flat)

    # Back to PyTorch NCL layout, drop batch padding.
    return jnp.transpose(out_t[:, :, :N], (2, 0, 1))               # (N, C_OUT, L_out)


if __name__ == "__main__":
    key = jax.random.PRNGKey(0)
    kx, kxb, kw, kb = jax.random.split(key, 4)

    # Deterministic parameter init (PyTorch ConvTranspose1d default: U(-bound, bound))
    fan = C_OUT * K
    bound = 1.0 / np.sqrt(fan)
    weight = jax.random.uniform(kw, (C_IN, C_OUT, K), jnp.float32, -bound, bound)
    bias = jax.random.uniform(kb, (C_OUT,), jnp.float32, -bound, bound)

    # 1) The module's reference input shape (1, 1, 28): takes the fused small-N path.
    x_single = jax.random.normal(kx, (1, 1, 28), dtype=jnp.float32)
    out_s = jax.block_until_ready(conv_transpose1d_sigmoid(x_single, weight, bias))
    ref_s = _jnp_conv_transpose1d_sigmoid(x_single, weight, bias)
    assert out_s.shape == (1, C_OUT, 22), out_s.shape
    assert np.allclose(np.asarray(out_s), np.asarray(ref_s), rtol=1e-5, atol=1e-5)

    # 1b) Same input, but force the Pallas path (exercises batch padding to 128).
    out_sf = jax.block_until_ready(
        conv_transpose1d_sigmoid(x_single, weight, bias, min_pallas_batch=0))
    assert out_sf.shape == (1, C_OUT, 22), out_sf.shape
    assert np.allclose(np.asarray(out_sf), np.asarray(ref_s), rtol=1e-5, atol=1e-5)

    # 2) Batched input N=300: Pallas path, tile=256 -> grid=2 (2-TC parallel on v7x),
    #    exercises the batch-padding (300 -> 512 lanes) as well.
    x_batch = jax.random.normal(kxb, (300, 1, 28), dtype=jnp.float32)
    out_b = jax.block_until_ready(conv_transpose1d_sigmoid(x_batch, weight, bias))
    ref_b = _jnp_conv_transpose1d_sigmoid(x_batch, weight, bias)
    assert out_b.shape == (300, C_OUT, 22), out_b.shape
    assert np.allclose(np.asarray(out_b), np.asarray(ref_b), rtol=1e-5, atol=1e-5)

    print("KERNEL_OK")
</pallas_src>

<mosaic_0001>
module attributes {stable_mosaic.version = 11 : i64} {
  func.func @convtr_sigmoid_kernel(%arg0: i32, %arg1: memref<1x28x128xf32, #tpu.memory_space<vmem>>, %arg2: memref<20xf32, #tpu.memory_space<smem>>, %arg3: memref<4xf32, #tpu.memory_space<smem>>, %arg4: memref<4x22x128xf32, #tpu.memory_space<vmem>>) attributes {dimension_semantics = [#tpu.dimension_semantics<parallel>], iteration_bounds = array<i64: 1>, scalar_prefetch = 0 : i64, scratch_operands = 0 : i64, tpu.core_type = #tpu.core_type<tc>, window_params = [{transform_indices = @transform_0, window_bounds = array<i64: 1, 28, 128>}, {transform_indices = @transform_1, window_bounds = array<i64: 20>}, {transform_indices = @transform_2, window_bounds = array<i64: 4>}, {transform_indices = @transform_3, window_bounds = array<i64: 4, 22, 128>}]} {
    %c0 = arith.constant 0 : index
    %0 = memref.load %arg3[%c0] : memref<4xf32, #tpu.memory_space<smem>>
    %1 = vector.broadcast %0 : f32 to vector<22x128xf32>
    %c1 = arith.constant 1 : index
    %2 = memref.load %arg3[%c1] : memref<4xf32, #tpu.memory_space<smem>>
    %3 = vector.broadcast %2 : f32 to vector<22x128xf32>
    %c2 = arith.constant 2 : index
    %4 = memref.load %arg3[%c2] : memref<4xf32, #tpu.memory_space<smem>>
    %5 = vector.broadcast %4 : f32 to vector<22x128xf32>
    %c3 = arith.constant 3 : index
    %6 = memref.load %arg3[%c3] : memref<4xf32, #tpu.memory_space<smem>>
    %7 = vector.broadcast %6 : f32 to vector<22x128xf32>
    %c0_0 = arith.constant 0 : index
    %c5 = arith.constant 5 : index
    %c0_1 = arith.constant 0 : index
    %8 = vector.load %arg1[%c0_0, %c5, %c0_1] : memref<1x28x128xf32, #tpu.memory_space<vmem>>, vector<1x22x128xf32>
    %9 = vector.shape_cast %8 : vector<1x22x128xf32> to vector<22x128xf32>
    %c0_2 = arith.constant 0 : index
    %10 = memref.load %arg2[%c0_2] : memref<20xf32, #tpu.memory_space<smem>>
    %11 = vector.broadcast %10 : f32 to vector<22x128xf32>
    %12 = arith.mulf %11, %9 : vector<22x128xf32>
    %13 = arith.addf %1, %12 : vector<22x128xf32>
    %c5_3 = arith.constant 5 : index
    %14 = memref.load %arg2[%c5_3] : memref<20xf32, #tpu.memory_space<smem>>
    %15 = vector.broadcast %14 : f32 to vector<22x128xf32>
    %16 = arith.mulf %15, %9 : vector<22x128xf32>
    %17 = arith.addf %3, %16 : vector<22x128xf32>
    %c10 = arith.constant 10 : index
    %18 = memref.load %arg2[%c10] : memref<20xf32, #tpu.memory_space<smem>>
    %19 = vector.broadcast %18 : f32 to vector<22x128xf32>
    %20 = arith.mulf %19, %9 : vector<22x128xf32>
    %21 = arith.addf %5, %20 : vector<22x128xf32>
    %c15 = arith.constant 15 : index
    %22 = memref.load %arg2[%c15] : memref<20xf32, #tpu.memory_space<smem>>
    %23 = vector.broadcast %22 : f32 to vector<22x128xf32>
    %24 = arith.mulf %23, %9 : vector<22x128xf32>
    %25 = arith.addf %7, %24 : vector<22x128xf32>
    %c0_4 = arith.constant 0 : index
    %c4 = arith.constant 4 : index
    %c0_5 = arith.constant 0 : index
    %26 = vector.load %arg1[%c0_4, %c4, %c0_5] : memref<1x28x128xf32, #tpu.memory_space<vmem>>, vector<1x22x128xf32>
    %27 = vector.shape_cast %26 : vector<1x22x128xf32> to vector<22x128xf32>
    %c1_6 = arith.constant 1 : index
    %28 = memref.load %arg2[%c1_6] : memref<20xf32, #tpu.memory_space<smem>>
    %29 = vector.broadcast %28 : f32 to vector<22x128xf32>
    %30 = arith.mulf %29, %27 : vector<22x128xf32>
    %31 = arith.addf %13, %30 : vector<22x128xf32>
    %c6 = arith.constant 6 : index
    %32 = memref.load %arg2[%c6] : memref<20xf32, #tpu.memory_space<smem>>
    %33 = vector.broadcast %32 : f32 to vector<22x128xf32>
    %34 = arith.mulf %33, %27 : vector<22x128xf32>
    %35 = arith.addf %17, %34 : vector<22x128xf32>
    %c11 = arith.constant 11 : index
    %36 = memref.load %arg2[%c11] : memref<20xf32, #tpu.memory_space<smem>>
    %37 = vector.broadcast %36 : f32 to vector<22x128xf32>
    %38 = arith.mulf %37, %27 : vector<22x128xf32>
    %39 = arith.addf %21, %38 : vector<22x128xf32>
    %c16 = arith.constant 16 : index
    %40 = memref.load %arg2[%c16] : memref<20xf32, #tpu.memory_space<smem>>
    %41 = vector.broadcast %40 : f32 to vector<22x128xf32>
    %42 = arith.mulf %41, %27 : vector<22x128xf32>
    %43 = arith.addf %25, %42 : vector<22x128xf32>
    %c0_7 = arith.constant 0 : index
    %c3_8 = arith.constant 3 : index
    %c0_9 = arith.constant 0 : index
    %44 = vector.load %arg1[%c0_7, %c3_8, %c0_9] : memref<1x28x128xf32, #tpu.memory_space<vmem>>, vector<1x22x128xf32>
    %45 = vector.shape_cast %44 : vector<1x22x128xf32> to vector<22x128xf32>
    %c2_10 = arith.constant 2 : index
    %46 = memref.load %arg2[%c2_10] : memref<20xf32, #tpu.memory_space<smem>>
    %47 = vector.broadcast %46 : f32 to vector<22x128xf32>
    %48 = arith.mulf %47, %45 : vector<22x128xf32>
    %49 = arith.addf %31, %48 : vector<22x128xf32>
    %c7 = arith.constant 7 : index
    %50 = memref.load %arg2[%c7] : memref<20xf32, #tpu.memory_space<smem>>
    %51 = vector.broadcast %50 : f32 to vector<22x128xf32>
    %52 = arith.mulf %51, %45 : vector<22x128xf32>
    %53 = arith.addf %35, %52 : vector<22x128xf32>
    %c12 = arith.constant 12 : index
    %54 = memref.load %arg2[%c12] : memref<20xf32, #tpu.memory_space<smem>>
    %55 = vector.broadcast %54 : f32 to vector<22x128xf32>
    %56 = arith.mulf %55, %45 : vector<22x128xf32>
    %57 = arith.addf %39, %56 : vector<22x128xf32>
    %c17 = arith.constant 17 : index
    %58 = memref.load %arg2[%c17] : memref<20xf32, #tpu.memory_space<smem>>
    %59 = vector.broadcast %58 : f32 to vector<22x128xf32>
    %60 = arith.mulf %59, %45 : vector<22x128xf32>
    %61 = arith.addf %43, %60 : vector<22x128xf32>
    %c0_11 = arith.constant 0 : index
    %c2_12 = arith.constant 2 : index
    %c0_13 = arith.constant 0 : index
    %62 = vector.load %arg1[%c0_11, %c2_12, %c0_13] : memref<1x28x128xf32, #tpu.memory_space<vmem>>, vector<1x22x128xf32>
    %63 = vector.shape_cast %62 : vector<1x22x128xf32> to vector<22x128xf32>
    %c3_14 = arith.constant 3 : index
    %64 = memref.load %arg2[%c3_14] : memref<20xf32, #tpu.memory_space<smem>>
    %65 = vector.broadcast %64 : f32 to vector<22x128xf32>
    %66 = arith.mulf %65, %63 : vector<22x128xf32>
    %67 = arith.addf %49, %66 : vector<22x128xf32>
    %c8 = arith.constant 8 : index
    %68 = memref.load %arg2[%c8] : memref<20xf32, #tpu.memory_space<smem>>
    %69 = vector.broadcast %68 : f32 to vector<22x128xf32>
    %70 = arith.mulf %69, %63 : vector<22x128xf32>
    %71 = arith.addf %53, %70 : vector<22x128xf32>
    %c13 = arith.constant 13 : index
    %72 = memref.load %arg2[%c13] : memref<20xf32, #tpu.memory_space<smem>>
    %73 = vector.broadcast %72 : f32 to vector<22x128xf32>
    %74 = arith.mulf %73, %63 : vector<22x128xf32>
    %75 = arith.addf %57, %74 : vector<22x128xf32>
    %c18 = arith.constant 18 : index
    %76 = memref.load %arg2[%c18] : memref<20xf32, #tpu.memory_space<smem>>
    %77 = vector.broadcast %76 : f32 to vector<22x128xf32>
    %78 = arith.mulf %77, %63 : vector<22x128xf32>
    %79 = arith.addf %61, %78 : vector<22x128xf32>
    %c0_15 = arith.constant 0 : index
    %c1_16 = arith.constant 1 : index
    %c0_17 = arith.constant 0 : index
    %80 = vector.load %arg1[%c0_15, %c1_16, %c0_17] : memref<1x28x128xf32, #tpu.memory_space<vmem>>, vector<1x22x128xf32>
    %81 = vector.shape_cast %80 : vector<1x22x128xf32> to vector<22x128xf32>
    %c4_18 = arith.constant 4 : index
    %82 = memref.load %arg2[%c4_18] : memref<20xf32, #tpu.memory_space<smem>>
    %83 = vector.broadcast %82 : f32 to vector<22x128xf32>
    %84 = arith.mulf %83, %81 : vector<22x128xf32>
    %85 = arith.addf %67, %84 : vector<22x128xf32>
    %c9 = arith.constant 9 : index
    %86 = memref.load %arg2[%c9] : memref<20xf32, #tpu.memory_space<smem>>
    %87 = vector.broadcast %86 : f32 to vector<22x128xf32>
    %88 = arith.mulf %87, %81 : vector<22x128xf32>
    %89 = arith.addf %71, %88 : vector<22x128xf32>
    %c14 = arith.constant 14 : index
    %90 = memref.load %arg2[%c14] : memref<20xf32, #tpu.memory_space<smem>>
    %91 = vector.broadcast %90 : f32 to vector<22x128xf32>
    %92 = arith.mulf %91, %81 : vector<22x128xf32>
    %93 = arith.addf %75, %92 : vector<22x128xf32>
    %c19 = arith.constant 19 : index
    %94 = memref.load %arg2[%c19] : memref<20xf32, #tpu.memory_space<smem>>
    %95 = vector.broadcast %94 : f32 to vector<22x128xf32>
    %96 = arith.mulf %95, %81 : vector<22x128xf32>
    %97 = arith.addf %79, %96 : vector<22x128xf32>
    %cst = arith.constant 5.000000e-01 : f32
    %98 = vector.broadcast %cst : f32 to vector<22x128xf32>
    %99 = arith.mulf %98, %85 : vector<22x128xf32>
    %100 = math.tanh %99 : vector<22x128xf32>
    %cst_19 = arith.constant 5.000000e-01 : f32
    %101 = vector.broadcast %cst_19 : f32 to vector<22x128xf32>
    %102 = arith.mulf %101, %100 : vector<22x128xf32>
    %cst_20 = arith.constant 5.000000e-01 : f32
    %103 = vector.broadcast %cst_20 : f32 to vector<22x128xf32>
    %104 = arith.addf %102, %103 : vector<22x128xf32>
    %c0_21 = arith.constant 0 : index
    %c0_22 = arith.constant 0 : index
    %c0_23 = arith.constant 0 : index
    %105 = vector.load %arg4[%c0_21, %c0_22, %c0_23] : memref<4x22x128xf32, #tpu.memory_space<vmem>>, vector<1x22x128xf32>
    %106 = vector.shape_cast %105 : vector<1x22x128xf32> to vector<22x128xf32>
    %107 = vector.shape_cast %104 : vector<22x128xf32> to vector<1x22x128xf32>
    tpu.vector_store %arg4[%c0_21, %c0_22, %c0_23], %107 {strides = array<i32>} : memref<4x22x128xf32, #tpu.memory_space<vmem>>, vector<1x22x128xf32>,
    %cst_24 = arith.constant 5.000000e-01 : f32
    %108 = vector.broadcast %cst_24 : f32 to vector<22x128xf32>
    %109 = arith.mulf %108, %89 : vector<22x128xf32>
    %110 = math.tanh %109 : vector<22x128xf32>
    %cst_25 = arith.constant 5.000000e-01 : f32
    %111 = vector.broadcast %cst_25 : f32 to vector<22x128xf32>
    %112 = arith.mulf %111, %110 : vector<22x128xf32>
    %cst_26 = arith.constant 5.000000e-01 : f32
    %113 = vector.broadcast %cst_26 : f32 to vector<22x128xf32>
    %114 = arith.addf %112, %113 : vector<22x128xf32>
    %c1_27 = arith.constant 1 : index
    %c0_28 = arith.constant 0 : index
    %c0_29 = arith.constant 0 : index
    %115 = vector.load %arg4[%c1_27, %c0_28, %c0_29] : memref<4x22x128xf32, #tpu.memory_space<vmem>>, vector<1x22x128xf32>
    %116 = vector.shape_cast %115 : vector<1x22x128xf32> to vector<22x128xf32>
    %117 = vector.shape_cast %114 : vector<22x128xf32> to vector<1x22x128xf32>
    tpu.vector_store %arg4[%c1_27, %c0_28, %c0_29], %117 {strides = array<i32>} : memref<4x22x128xf32, #tpu.memory_space<vmem>>, vector<1x22x128xf32>,
    %cst_30 = arith.constant 5.000000e-01 : f32
    %118 = vector.broadcast %cst_30 : f32 to vector<22x128xf32>
    %119 = arith.mulf %118, %93 : vector<22x128xf32>
    %120 = math.tanh %119 : vector<22x128xf32>
    %cst_31 = arith.constant 5.000000e-01 : f32
    %121 = vector.broadcast %cst_31 : f32 to vector<22x128xf32>
    %122 = arith.mulf %121, %120 : vector<22x128xf32>
    %cst_32 = arith.constant 5.000000e-01 : f32
    %123 = vector.broadcast %cst_32 : f32 to vector<22x128xf32>
    %124 = arith.addf %122, %123 : vector<22x128xf32>
    %c2_33 = arith.constant 2 : index
    %c0_34 = arith.constant 0 : index
    %c0_35 = arith.constant 0 : index
    %125 = vector.load %arg4[%c2_33, %c0_34, %c0_35] : memref<4x22x128xf32, #tpu.memory_space<vmem>>, vector<1x22x128xf32>
    %126 = vector.shape_cast %125 : vector<1x22x128xf32> to vector<22x128xf32>
    %127 = vector.shape_cast %124 : vector<22x128xf32> to vector<1x22x128xf32>
    tpu.vector_store %arg4[%c2_33, %c0_34, %c0_35], %127 {strides = array<i32>} : memref<4x22x128xf32, #tpu.memory_space<vmem>>, vector<1x22x128xf32>,
    %cst_36 = arith.constant 5.000000e-01 : f32
    %128 = vector.broadcast %cst_36 : f32 to vector<22x128xf32>
    %129 = arith.mulf %128, %97 : vector<22x128xf32>
    %130 = math.tanh %129 : vector<22x128xf32>
    %cst_37 = arith.constant 5.000000e-01 : f32
    %131 = vector.broadcast %cst_37 : f32 to vector<22x128xf32>
    %132 = arith.mulf %131, %130 : vector<22x128xf32>
    %cst_38 = arith.constant 5.000000e-01 : f32
    %133 = vector.broadcast %cst_38 : f32 to vector<22x128xf32>
    %134 = arith.addf %132, %133 : vector<22x128xf32>
    %c3_39 = arith.constant 3 : index
    %c0_40 = arith.constant 0 : index
    %c0_41 = arith.constant 0 : index
    %135 = vector.load %arg4[%c3_39, %c0_40, %c0_41] : memref<4x22x128xf32, #tpu.memory_space<vmem>>, vector<1x22x128xf32>
    %136 = vector.shape_cast %135 : vector<1x22x128xf32> to vector<22x128xf32>
    %137 = vector.shape_cast %134 : vector<22x128xf32> to vector<1x22x128xf32>
    tpu.vector_store %arg4[%c3_39, %c0_40, %c0_41], %137 {strides = array<i32>} : memref<4x22x128xf32, #tpu.memory_space<vmem>>, vector<1x22x128xf32>,
    return
  }
  func.func @transform_0(%arg0: i32) -> (i32, i32, i32) {
    %c0_i32 = arith.constant 0 : i32
    %c0_i32_0 = arith.constant 0 : i32
    %c0_i32_1 = arith.constant 0 : i32
    return %c0_i32, %c0_i32_0, %arg0 : i32, i32, i32
  }
  func.func @transform_1(%arg0: i32) -> i32 {
    %c0_i32 = arith.constant 0 : i32
    %c0_i32_0 = arith.constant 0 : i32
    return %c0_i32 : i32
  }
  func.func @transform_2(%arg0: i32) -> i32 {
    %c0_i32 = arith.constant 0 : i32
    %c0_i32_0 = arith.constant 0 : i32
    return %c0_i32 : i32
  }
  func.func @transform_3(%arg0: i32) -> (i32, i32, i32) {
    %c0_i32 = arith.constant 0 : i32
    %c0_i32_0 = arith.constant 0 : i32
    %c0_i32_1 = arith.constant 0 : i32
    return %c0_i32, %c0_i32_0, %arg0 : i32, i32, i32
  }
}

</mosaic_0001>

<bundles_post_ra>
// kernel: tpu_custom_call.1
= control target key start
LH: loop header
LB: loop body
LE: loop exit
PB: predicated region body
PF: predicated region fallthrough
CT: control target
= control target key end

     0   :  { %8 = vsyncpa [#allocation3], 0  ;;  %s626_s0 = inlined_call_operand.vmem [shape: f32[1,28,128], index: 0, kind: input, shape index: {}]   ;;  %s627_s1 = inlined_call_operand.vmem [shape: f32[20], index: 1, kind: input, shape index: {}]   ;;  %s628_s2 = inlined_call_operand.vmem [shape: f32[4], index: 2, kind: input, shape index: {}]   ;;  %s629_s3 = inlined_call_operand.vmem [shape: f32[4,22,128], index: 3, kind: output, shape index: {}]  }
   0x1   :  { %s18_s14 = sshll.u32 %s627_s1, 4  ;;  %s19_s14 = int_to_ptr.vmem [resolvable:$true] %s18_s14 }
   0x2   :  { %9 = vsyncpa [#allocation5], 0  ;;  %s28_s17 = sshll.u32 %s628_s2, 4  ;;  %s348_s18 = scalar_lea.vmem %s19_s14, 16  ;;  %s29_s17 = int_to_ptr.vmem [resolvable:$true] %s28_s17 }
   0x3   :  { %p349_p0 = scmp.ne.s32.totalorder %s19_s14, %s348_s18  ;;  %p353_p1 = scmp.lt.s32.totalorder %s19_s14, %s19_s14 }
   0x4   :  { %p354_p2 = scmp.lt.s32.totalorder %s348_s18, %s348_s18 }
   0x6   :  { %p355_p3 = por %p354_p2, %p353_p1 }
   0x8   :  { %p356_p4 = pnand %p355_p3, %p349_p0 }
   0xa   :  { %359 = shalt.err (!%p356_p4)
}
   0xb   :  { %s376_s19 = smov [#allocation2]   ;;  %s360_s20 = scalar_lea.vmem %s29_s17, 16 }
   0xc   :  { %21 = dma.vmem_to_smem %s19_s14, 16, %s376_s19, [#allocation3]  }
   0xd   :  { %p361_p5 = scmp.ne.s32.totalorder %s29_s17, %s360_s20  ;;  %p365_p6 = scmp.lt.s32.totalorder %s29_s17, %s29_s17 }
   0xe   :  { %p366_p7 = scmp.lt.s32.totalorder %s360_s20, %s360_s20 }
  0x10   :  { %p367_p8 = por %p366_p7, %p365_p6 }
  0x12   :  { %p368_p9 = pnand %p367_p8, %p361_p5 }
  0x14   :  { %371 = shalt.err (!%p368_p9)
}
  0x15   :  { %s377_s1 = smov [#allocation4]  }
  0x16   :  { %31 = dma.vmem_to_smem %s29_s17, 16, %s377_s1, [#allocation5]  }
  0x17   :  { %372 = dma.done.wait [#allocation3], 16  }
  0x18   :  { %373 = vsyncadd [#allocation3], 4294967280 }
  0x19   :  { %374 = dma.done.wait [#allocation5], 16  }
  0x1a   :  { %375 = vsyncadd [#allocation5], 4294967280 }
  0x1b   :  { %38 = sfence }
  0x1c   :  { %s39_s2 = sld [smem:[#allocation4]]  ;;  %v409_v0 = vld [vmem:[%s626_s0 + $0x5] sm:$0xff]  ;;  %v416_v1 = vld [vmem:[%s626_s0 + $0xd] sm:$0xff]  ;;  %v421_v2 = vld [vmem:[%s626_s0 + $0x15] sm:$0x3f] }
  0x1d   :  { %s50_s21 = sld [smem:[#allocation2]]  ;;  %v426_v3 = vld [vmem:[%s626_s0 + $0x4] sm:$0xff]  ;;  %v431_v4 = vld [vmem:[%s626_s0 + $0xc] sm:$0xff]  ;;  %v436_v5 = vld [vmem:[%s626_s0 + $0x14] sm:$0x3f] }
  0x1e   :  { %s297_s22 = sld [smem:[#allocation2 + $0x1]]  ;;  %v443_v8 = vld [vmem:[%s626_s0 + $0x3] sm:$0xff]  ;;  %v457_v13 = vld [vmem:[%s626_s0 + $0xb] sm:$0xff]  ;;  %v483_v22 = vld [vmem:[%s626_s0 + $0x13] sm:$0x3f] }
  0x1f   :  { %s301_s23 = sld [smem:[#allocation2 + $0x2]]  ;;  %v451_v11 = vld [vmem:[%s626_s0 + $0x2] sm:$0xff]  ;;  %v462_v14 = vld [vmem:[%s626_s0 + $0xa] sm:$0xff]  ;;  %v490_v27 = vld [vmem:[%s626_s0 + $0x12] sm:$0x3f] }
  0x20   :  { %s404_s24 = sld [smem:[#allocation2 + $0x3]]  ;;  %v471_v18 = vld [vmem:[%s626_s0 + $0x1] sm:$0xff]  ;;  %v477_v20 = vld [vmem:[%s626_s0 + $0x9] sm:$0xff]  ;;  %v495_v28 = vld [vmem:[%s626_s0 + $0x11] sm:$0x3f] }
  0x21   :  { %s411_s27 = sld [smem:[#allocation2 + $0x4]] }
  0x22   :  { %s438_s11 = sld [smem:[#allocation4 + $0x1]]  ;;  %v40_v6 = vstv %s39_s2 }
  0x23   :  { %v51_v7 = vstv %s50_s21  ;;  %s445_s14 = sld [smem:[#allocation2 + $0x5]] }
  0x24   :  { %v52_v9 = vmul.f32 %v51_v7, %v409_v0  ;;  %v86_v10 = vstv %s297_s22  ;;  %v53_v12 = vmul.f32 %v51_v7, %v416_v1  ;;  %v54_v15 = vmul.f32 %v51_v7, %v421_v2  ;;  %s465_s1 = sld [smem:[#allocation2 + $0x6]] }
  0x25   :  { %v87_v16 = vmul.f32 %v86_v10, %v426_v3  ;;  %v121_v17 = vstv %s301_s23  ;;  %v88_v19 = vmul.f32 %v86_v10, %v431_v4  ;;  %v89_v21 = vmul.f32 %v86_v10, %v436_v5  ;;  %s302_s23 = sld [smem:[#allocation2 + $0x7]] }
  0x26   :  { %v55_v23 = vadd.f32 %v52_v9, %v40_v6  ;;  %v122_v24 = vmul.f32 %v121_v17, %v443_v8  ;;  %v156_v25 = vstv %s404_s24  ;;  %v56_v26 = vadd.f32 %v53_v12, %v40_v6  ;;  %s306_s6 = sld [smem:[#allocation2 + $0x8]] }
  0x27   :  { %v157_v29 = vmul.f32 %v156_v25, %v451_v11  ;;  %v191_v30 = vstv %s411_s27  ;;  %v123_v31 = vmul.f32 %v121_v17, %v457_v13  ;;  %v158_v32 = vmul.f32 %v156_v25, %v462_v14  ;;  %s310_s24 = sld [smem:[#allocation2 + $0x9]] }
  0x28   :  { %v90_v33 = vadd.f32 %v87_v16, %v55_v23  ;;  %v192_v34 = vmul.f32 %v191_v30, %v471_v18  ;;  %v91_v35 = vadd.f32 %v88_v19, %v56_v26  ;;  %v193_v36 = vmul.f32 %v191_v30, %v477_v20  ;;  %s510_s0 = sld [smem:[#allocation4 + $0x2]] }
  0x29   :  { %v57_v37 = vadd.f32 %v54_v15, %v40_v6  ;;  %v124_v38 = vmul.f32 %v121_v17, %v483_v22  ;;  %v159_v39 = vmul.f32 %v156_v25, %v490_v27  ;;  %v194_v40 = vmul.f32 %v191_v30, %v495_v28  ;;  %s514_s27 = sld [smem:[#allocation2 + $0xa]] }
  0x2a   :  { %v125_v41 = vadd.f32 %v122_v24, %v90_v33  ;;  %v126_v42 = vadd.f32 %v123_v31, %v91_v35  ;;  %v42_v43 = vstv %s438_s11  ;;  %v59_v44 = vstv %s445_s14  ;;  %s516_s7 = sld [smem:[#allocation2 + $0xb]] }
  0x2b   :  { %v92_v45 = vadd.f32 %v89_v21, %v57_v37  ;;  %v60_v46 = vmul.f32 %v59_v44, %v409_v0  ;;  %v94_v47 = vstv %s465_s1  ;;  %v129_v48 = vstv %s302_s23  ;;  %s520_s8 = sld [smem:[#allocation2 + $0xc]] }
  0x2c   :  { %v160_v49 = vadd.f32 %v157_v29, %v125_v41  ;;  %v161_v50 = vadd.f32 %v158_v32, %v126_v42  ;;  %v95_v51 = vmul.f32 %v94_v47, %v426_v3  ;;  %v130_v52 = vmul.f32 %v129_v48, %v443_v8  ;;  %s524_s9 = sld [smem:[#allocation2 + $0xd]] }
  0x2d   :  { %v127_v53 = vadd.f32 %v124_v38, %v92_v45  ;;  %v63_v54 = vadd.f32 %v60_v46, %v42_v43  ;;  %v164_v55 = vstv %s306_s6  ;;  %v199_v56 = vstv %s310_s24  ;;  %s528_s10 = sld [smem:[#allocation2 + $0xe]] }
  0x2e   :  { %v195_v57 = vadd.f32 %v192_v34, %v160_v49  ;;  %v196_v58 = vadd.f32 %v193_v36, %v161_v50  ;;  %v165_v59 = vmul.f32 %v164_v55, %v451_v11  ;;  %v200_v60 = vmul.f32 %v199_v56, %v471_v18  ;;  %s538_s11 = sld [smem:[#allocation4 + $0x3]] }
  0x2f   :  { %v162_v61 = vadd.f32 %v159_v39, %v127_v53  ;;  %v98_v62 = vadd.f32 %v95_v51, %v63_v54  ;;  %v61_v63 = vmul.f32 %v59_v44, %v416_v1  ;;  %v96_v6 = vmul.f32 %v94_v47, %v431_v4  ;;  %s543_s12 = sld [smem:[#allocation2 + $0xf]] }
  0x30   :  { %v222_v7 = vmul.f32 0.5, %v195_v57  ;;  %v223_v9 = vmul.f32 0.5, %v196_v58  ;;  %v131_v10 = vmul.f32 %v129_v48, %v457_v13  ;;  %v166_v12 = vmul.f32 %v164_v55, %v462_v14  ;;  %s547_s13 = sld [smem:[#allocation2 + $0x10]] }
  0x31   :  { %v197_v15 = vadd.f32 %v194_v40, %v162_v61  ;;  %v133_v16 = vadd.f32 %v130_v52, %v98_v62  ;;  %v64_v17 = vadd.f32 %v61_v63, %v42_v43  ;;  %v201_v19 = vmul.f32 %v199_v56, %v477_v20  ;;  %s555_s14 = sld [smem:[#allocation2 + $0x11]] }
  0x32   :  { %324 = vtanh.f32 %v222_v7  ;;  %v62_v21 = vmul.f32 %v59_v44, %v421_v2  ;;  %v97_v23 = vmul.f32 %v94_v47, %v436_v5  ;;  %v132_v24 = vmul.f32 %v129_v48, %v483_v22  ;;  %s561_s15 = sld [smem:[#allocation2 + $0x12]] }
  0x33   :  { %326 = vtanh.f32 %v223_v9  ;;  %v224_v25 = vmul.f32 0.5, %v197_v15  ;;  %v168_v26 = vadd.f32 %v165_v59, %v133_v16  ;;  %v99_v29 = vadd.f32 %v96_v6, %v64_v17  ;;  %s566_s16 = sld [smem:[#allocation2 + $0x13]] }
  0x34   :  { %v65_v30 = vadd.f32 %v62_v21, %v42_v43  ;;  %v167_v31 = vmul.f32 %v164_v55, %v490_v27  ;;  %v202_v32 = vmul.f32 %v199_v56, %v495_v28  ;;  %v44_v33 = vstv %s510_s0 }
  0x35   :  { %328 = vtanh.f32 %v224_v25  ;;  %v203_v34 = vadd.f32 %v200_v60, %v168_v26  ;;  %v134_v35 = vadd.f32 %v131_v10, %v99_v29  ;;  %v67_v36 = vstv %s514_s27 }
  0x36   :  { %v100_v37 = vadd.f32 %v97_v23, %v65_v30  ;;  %v68_v38 = vmul.f32 %v67_v36, %v409_v0  ;;  %v102_v39 = vstv %s516_s7  ;;  %v137_v40 = vstv %s520_s8 }
  0x37   :  { %v237_v41 = vmul.f32 0.5, %v203_v34  ;;  %v169_v42 = vadd.f32 %v166_v12, %v134_v35  ;;  %v103_v43 = vmul.f32 %v102_v39, %v426_v3  ;;  %v138_v44 = vmul.f32 %v137_v40, %v443_v8 }
  0x38   :  { %v135_v45 = vadd.f32 %v132_v24, %v100_v37  ;;  %v71_v46 = vadd.f32 %v68_v38, %v44_v33  ;;  %v172_v47 = vstv %s524_s9  ;;  %v207_v48 = vstv %s528_s10 }
  0x39   :  { %330 = vtanh.f32 %v237_v41  ;;  %v204_v49 = vadd.f32 %v201_v19, %v169_v42  ;;  %v173_v50 = vmul.f32 %v172_v47, %v451_v11  ;;  %v208_v51 = vmul.f32 %v207_v48, %v471_v18 }
  0x3a   :  { %v170_v52 = vadd.f32 %v167_v31, %v135_v45  ;;  %v106_v53 = vadd.f32 %v103_v43, %v71_v46  ;;  %v69_v54 = vmul.f32 %v67_v36, %v416_v1  ;;  %v104_v55 = vmul.f32 %v102_v39, %v431_v4 }
  0x3b   :  { %v238_v56 = vmul.f32 0.5, %v204_v49  ;;  %v139_v57 = vmul.f32 %v137_v40, %v457_v13  ;;  %v174_v58 = vmul.f32 %v172_v47, %v462_v14  ;;  %v209_v59 = vmul.f32 %v207_v48, %v477_v20 }
  0x3c   :  { %v205_v60 = vadd.f32 %v202_v32, %v170_v52  ;;  %v141_v61 = vadd.f32 %v138_v44, %v106_v53  ;;  %v72_v62 = vadd.f32 %v69_v54, %v44_v33  ;;  %v70_v63 = vmul.f32 %v67_v36, %v421_v2 }
  0x3d   :  { %332 = vtanh.f32 %v238_v56  ;;  %v105_v6 = vmul.f32 %v102_v39, %v436_v5  ;;  %v140_v7 = vmul.f32 %v137_v40, %v483_v22  ;;  %v175_v9 = vmul.f32 %v172_v47, %v490_v27 }
  0x3e   :  { %v239_v10 = vmul.f32 0.5, %v205_v60  ;;  %v176_v12 = vadd.f32 %v173_v50, %v141_v61  ;;  %v107_v15 = vadd.f32 %v104_v55, %v72_v62  ;;  %v73_v16 = vadd.f32 %v70_v63, %v44_v33 }
  0x3f   :  { %v325_v17 = vpop.eup %324  ;;  %v210_v19 = vmul.f32 %v207_v48, %v495_v28  ;;  %v46_v21 = vstv %s538_s11  ;;  %v75_v23 = vstv %s543_s12  ;;  %v110_v24 = vstv %s547_s13 }
  0x40   :  { %v327_v25 = vpop.eup %326  ;;  %v228_v26 = vmul.f32 0.5, %v325_v17  ;;  %334 = vtanh.f32 %v239_v10  ;;  %v211_v29 = vadd.f32 %v208_v51, %v176_v12  ;;  %v142_v30 = vadd.f32 %v139_v57, %v107_v15 }
  0x41   :  { %v229_v31 = vmul.f32 0.5, %v327_v25  ;;  %v108_v32 = vadd.f32 %v105_v6, %v73_v16  ;;  %v76_v34 = vmul.f32 %v75_v23, %v409_v0  ;;  %v111_v33 = vmul.f32 %v110_v24, %v426_v3 }
  0x42   :  { %v329_v35 = vpop.eup %328  ;;  %v231_v36 = vadd.f32 0.5, %v228_v26  ;;  %v253_v37 = vmul.f32 0.5, %v211_v29  ;;  %v177_v38 = vadd.f32 %v174_v58, %v142_v30  ;;  %v145_v39 = vstv %s555_s14 }
  0x43   :  { %v232_v40 = vadd.f32 0.5, %v229_v31  ;;  %v230_v41 = vmul.f32 0.5, %v329_v35  ;;  %v143_v42 = vadd.f32 %v140_v7, %v108_v32  ;;  %v79_v43 = vadd.f32 %v76_v34, %v46_v21 }
  0x44   :  { %234 = vst [vmem:[%s629_s3] sm:$0xff] %v231_v36  ;;  %336 = vtanh.f32 %v253_v37  ;;  %v212_v44 = vadd.f32 %v209_v59, %v177_v38  ;;  %v146_v0 = vmul.f32 %v145_v39, %v443_v8  ;;  %v180_v45 = vstv %s561_s15 }
  0x45   :  { %235 = vst [vmem:[%s629_s3 + $0x8] sm:$0xff] %v232_v40  ;;  %v233_v3 = vadd.f32 0.5, %v230_v41  ;;  %v178_v46 = vadd.f32 %v175_v9, %v143_v42  ;;  %v114_v47 = vadd.f32 %v111_v33, %v79_v43  ;;  %v181_v48 = vmul.f32 %v180_v45, %v451_v11 }
  0x46   :  { %v331_v49 = vpop.eup %330  ;;  %v254_v50 = vmul.f32 0.5, %v212_v44  ;;  %v215_v51 = vstv %s566_s16  ;;  %v77_v52 = vmul.f32 %v75_v23, %v416_v1  ;;  %v112_v53 = vmul.f32 %v110_v24, %v431_v4 }
  0x47   :  { %236 = vst [vmem:[%s629_s3 + $0x10] sm:$0x3f] %v233_v3  ;;  %v243_v8 = vmul.f32 0.5, %v331_v49  ;;  %v213_v54 = vadd.f32 %v210_v19, %v178_v46  ;;  %v149_v55 = vadd.f32 %v146_v0, %v114_v47  ;;  %v216_v56 = vmul.f32 %v215_v51, %v471_v18 }
  0x48   :  { %338 = vtanh.f32 %v254_v50  ;;  %v80_v57 = vadd.f32 %v77_v52, %v46_v21  ;;  %v147_v11 = vmul.f32 %v145_v39, %v457_v13  ;;  %v182_v4 = vmul.f32 %v180_v45, %v462_v14 }
  0x49   :  { %v246_v58 = vadd.f32 0.5, %v243_v8  ;;  %v255_v59 = vmul.f32 0.5, %v213_v54  ;;  %v184_v60 = vadd.f32 %v181_v48, %v149_v55  ;;  %v78_v62 = vmul.f32 %v75_v23, %v421_v2 }
  0x4a   :  { %v333_v61 = vpop.eup %332  ;;  %v115_v1 = vadd.f32 %v112_v53, %v80_v57  ;;  %v113_v63 = vmul.f32 %v110_v24, %v436_v5  ;;  %v217_v13 = vmul.f32 %v215_v51, %v477_v20  ;;  %v148_v10 = vmul.f32 %v145_v39, %v483_v22 }
  0x4b   :  { %313 = vst [vmem:[%s629_s3 + $0x18] sm:$0xff] %v246_v58  ;;  %v244_v18 = vmul.f32 0.5, %v333_v61  ;;  %340 = vtanh.f32 %v255_v59  ;;  %v219_v6 = vadd.f32 %v216_v56, %v184_v60  ;;  %v81_v9 = vadd.f32 %v78_v62, %v46_v21 }
  0x4c   :  { %v150_v7 = vadd.f32 %v147_v11, %v115_v1  ;;  %v183_v5 = vmul.f32 %v180_v45, %v490_v27  ;;  %v218_v20 = vmul.f32 %v215_v51, %v495_v28 }
  0x4d   :  { %v335_v12 = vpop.eup %334  ;;  %v247_v15 = vadd.f32 0.5, %v244_v18  ;;  %v269_v14 = vmul.f32 0.5, %v219_v6  ;;  %v116_v17 = vadd.f32 %v113_v63, %v81_v9 }
  0x4e   :  { %v245_v16 = vmul.f32 0.5, %v335_v12  ;;  %v185_v2 = vadd.f32 %v182_v4, %v150_v7 }
  0x4f   :  { %314 = vst [vmem:[%s629_s3 + $0x20] sm:$0xff] %v247_v15  ;;  %342 = vtanh.f32 %v269_v14  ;;  %v151_v24 = vadd.f32 %v148_v10, %v116_v17 }
  0x50   :  { %v248_v19 = vadd.f32 0.5, %v245_v16  ;;  %v220_v23 = vadd.f32 %v217_v13, %v185_v2 }
  0x51   :  { %v337_v21 = vpop.eup %336  ;;  %v186_v26 = vadd.f32 %v183_v5, %v151_v24 }
  0x52   :  { %315 = vst [vmem:[%s629_s3 + $0x28] sm:$0x3f] %v248_v19  ;;  %v259_v22 = vmul.f32 0.5, %v337_v21  ;;  %v270_v25 = vmul.f32 0.5, %v220_v23 }
  0x53   :  { %v221_v27 = vadd.f32 %v218_v20, %v186_v26 }
  0x54   :  { %v262_v29 = vadd.f32 0.5, %v259_v22  ;;  %344 = vtanh.f32 %v270_v25 }
  0x55   :  { %v339_v30 = vpop.eup %338  ;;  %v271_v32 = vmul.f32 0.5, %v221_v27 }
  0x56   :  { %316 = vst [vmem:[%s629_s3 + $0x30] sm:$0xff] %v262_v29  ;;  %v260_v31 = vmul.f32 0.5, %v339_v30 }
  0x57   :  { %346 = vtanh.f32 %v271_v32 }
  0x58   :  { %v341_v34 = vpop.eup %340  ;;  %v263_v28 = vadd.f32 0.5, %v260_v31 }
  0x59   :  { %v261_v33 = vmul.f32 0.5, %v341_v34 }
  0x5a   :  { %317 = vst [vmem:[%s629_s3 + $0x38] sm:$0xff] %v263_v28 }
  0x5b   :  { %v264_v35 = vadd.f32 0.5, %v261_v33 }
  0x5c   :  { %v343_v36 = vpop.eup %342 }
  0x5d   :  { %318 = vst [vmem:[%s629_s3 + $0x40] sm:$0x3f] %v264_v35  ;;  %v275_v37 = vmul.f32 0.5, %v343_v36 }
  0x5f   :  { %v278_v38 = vadd.f32 0.5, %v275_v37 }
  0x61   :  { %v345_v39 = vpop.eup %344  ;;  %319 = vst [vmem:[%s629_s3 + $0x48] sm:$0xff] %v278_v38 }
  0x62   :  { %v276_v40 = vmul.f32 0.5, %v345_v39 }
  0x64   :  { %v279_v41 = vadd.f32 0.5, %v276_v40  ;;  %v347_v42 = vpop.eup %346 }
  0x65   :  { %v277_v43 = vmul.f32 0.5, %v347_v42 }
  0x66   :  { %320 = vst [vmem:[%s629_s3 + $0x50] sm:$0xff] %v279_v41 }
  0x67   :  { %v280_v44 = vadd.f32 0.5, %v277_v43 }
  0x69   :  { %321 = vst [vmem:[%s629_s3 + $0x58] sm:$0x3f] %v280_v44 }
  0x6a   :  { %289 = vsyncpa [#allocation3], 1 }
  0x6b   :  { %290 = vsyncpa [#allocation5], 1 }

</bundles_post_ra>
